<compile_context>
chip_gen: v7x
topology: tpu7x:2x2x1
jax: 0.10.0
libtpu: 0.0.40
codegen_flags: <defaults>
</compile_context>

<pallas_src>
import numpy as np
import jax
import jax.numpy as jnp
from jax.experimental import pallas as pl
from jax.experimental.pallas import tpu as pltpu


def _round8(x):
    return max(8, ((int(x) + 7) // 8) * 8)


# --------------------------- parameter helpers -----------------------------

def xavier_uniform(key, shape, gain):
    fan_out, fan_in = shape
    a = gain * np.sqrt(6.0 / (fan_in + fan_out))
    return jax.random.uniform(key, shape, jnp.float32, -a, a)


def orthogonal(key, shape, gain):
    rows, cols = shape
    a = jax.random.normal(key, (max(rows, cols), min(rows, cols)), jnp.float32)
    q, r = jnp.linalg.qr(a)
    q = q * jnp.sign(jnp.diag(r))[None, :]
    if rows < cols:
        q = q.T
    return gain * q[:rows, :cols]


def default_bias(key, fan_in, n):
    bound = 1.0 / np.sqrt(fan_in)
    return jax.random.uniform(key, (n,), jnp.float32, -bound, bound)


def init_params(key, n_features, n_hidden):
    gain = np.sqrt(2.0)  # relu gain
    keys = jax.random.split(key, 10)
    return {
        # RecNN
        "Wu": xavier_uniform(keys[0], (n_hidden, n_features), gain),
        "bu": default_bias(keys[1], n_features, n_hidden),
        "Wh": orthogonal(keys[2], (n_hidden, 3 * n_hidden), gain),
        "bh": default_bias(keys[3], 3 * n_hidden, n_hidden),
        # Predict head
        "W1": xavier_uniform(keys[4], (n_hidden, n_hidden), gain),
        "b1": default_bias(keys[5], n_hidden, n_hidden),
        "W2": xavier_uniform(keys[6], (n_hidden, n_hidden), gain),
        "b2": default_bias(keys[7], n_hidden, n_hidden),
        "W3": xavier_uniform(keys[8], (1, n_hidden), gain),
        "b3": jnp.ones((1,), jnp.float32),  # nn.init.constant(fc3.bias, 1)
    }


def slab_layout(n_features, n_hidden):
    """Row offsets of each parameter block inside the packed (rows, H) slab.

    Every block starts on an 8-row (sublane-tile) boundary so in-kernel static
    row slices never straddle a partially-owned tile.
    """
    H = n_hidden
    f_pad = _round8(n_features)
    off_wu = 0
    off_wh = off_wu + f_pad        # Wh.T, (3H, H)
    off_w1 = off_wh + 3 * H        # W1.T, (H, H)
    off_w2 = off_w1 + H            # W2.T, (H, H)
    off_misc = off_w2 + H          # biases + w3 + b3, 8 rows
    rows = off_misc + 8
    return dict(f_pad=f_pad, wu=off_wu, wh=off_wh, w1=off_w1, w2=off_w2,
                misc=off_misc, rows=rows)


def pack_param_slab(params, n_features, n_hidden):
    """One-time layout plumbing: transpose to (K, N) and pack into one slab."""
    H = n_hidden
    L = slab_layout(n_features, n_hidden)
    slab = np.zeros((L["rows"], H), np.float32)
    slab[L["wu"]:L["wu"] + n_features, :] = np.asarray(params["Wu"]).T
    slab[L["wh"]:L["wh"] + 3 * H, :] = np.asarray(params["Wh"]).T
    slab[L["w1"]:L["w1"] + H, :] = np.asarray(params["W1"]).T
    slab[L["w2"]:L["w2"] + H, :] = np.asarray(params["W2"]).T
    m = L["misc"]
    slab[m + 0, :] = np.asarray(params["bu"])
    slab[m + 1, :] = np.asarray(params["bh"])
    slab[m + 2, :] = np.asarray(params["b1"])
    slab[m + 3, :] = np.asarray(params["b2"])
    slab[m + 4, :] = np.asarray(params["W3"]).reshape(-1)
    slab[m + 5, 0] = float(np.asarray(params["b3"]).reshape(-1)[0])
    return jnp.asarray(slab)


# --------------------- synthetic jet batch (complete trees) ----------------

def make_jet_batch(n_jets, depth, n_features, key):
    """Per-level structure equivalent to recnn's batch() for complete binary trees.

    Returns (children, n_inners, contents) where for level j:
      contents[j]: (n_jets * 2**j, n_features) node features (jnp)
      children[j]: (n_inner_j, 2) int32 positions into level j+1's embeddings (np)
      n_inners[j]: number of inner nodes at level j (inner nodes come first)
    """
    children, n_inners, contents = [], [], []
    for j in range(depth):
        per_jet = 2 ** j
        n_nodes = n_jets * per_jet
        if j < depth - 1:
            n_inner = n_nodes
            ch = np.zeros((n_nodes, 2), dtype=np.int32)
            for jet in range(n_jets):
                for p in range(per_jet):
                    node = jet * per_jet + p
                    base = jet * (2 * per_jet)
                    ch[node, 0] = base + 2 * p
                    ch[node, 1] = base + 2 * p + 1
        else:
            n_inner = 0
            ch = np.zeros((0, 2), dtype=np.int32)
        key, sub = jax.random.split(key)
        contents.append(jax.random.normal(sub, (n_nodes, n_features), jnp.float32))
        children.append(ch)
        n_inners.append(n_inner)
    return children, n_inners, contents


# --------------------------- fused Pallas kernel ----------------------------

def build_fused_predict(level_sizes, n_inners, n_features, n_hidden, n_jets):
    depth = len(level_sizes)
    H = n_hidden
    L = slab_layout(n_features, n_hidden)
    f_pad = L["f_pad"]
    m = L["misc"]
    level_offsets = [int(v) for v in np.cumsum([0] + list(level_sizes))[:-1]]
    total_nodes = int(sum(level_sizes))
    max_level = int(max(level_sizes))
    max_inner = int(max([1] + list(n_inners)))

    u_rows = _round8(total_nodes)
    emb_rows = _round8(max_level)
    cat_rows = _round8(max_inner)

    def kernel(contents_ref, slab_ref, out_ref,
               u_scr, emb_a, emb_b, cat_scr):
        # Loop-invariant parameter reads, hoisted (the level loop is unrolled).
        bu = slab_ref[m + 0:m + 1, :]
        bh = slab_ref[m + 1:m + 2, :]
        wht = slab_ref[L["wh"]:L["wh"] + 3 * H, :]          # (3H, H)

        # fc_u + relu over every node of every level in a single MXU pass.
        # (contents is zero-padded to (u_rows, f_pad) in the wrapper.)
        u_all = jnp.dot(contents_ref[...],
                        slab_ref[L["wu"]:L["wu"] + f_pad, :],
                        preferred_element_type=jnp.float32)
        u_scr[...] = jnp.maximum(u_all + bu, 0.0)

        # Bottom-up recursion; level embeddings ping-pong between VMEM buffers.
        bufs = (emb_a, emb_b)
        prev = None
        for step, j in enumerate(range(depth - 1, -1, -1)):
            cur = bufs[step % 2]
            size = level_sizes[j]
            off = level_offsets[j]
            ni = n_inners[j]
            if ni == 0:
                # Leaf level: embedding is just relu(fc_u).
                cur[0:size, :] = u_scr[off:off + size, :]
            else:
                # Complete-tree batch: left children are the even rows, right
                # children the odd rows of the previous level, so the child
                # gather is two O(1) strided slices (no per-row copies).
                cat_scr[0:ni, 0:H] = prev[pl.ds(0, ni, stride=2), :]
                cat_scr[0:ni, H:2 * H] = prev[pl.ds(1, ni, stride=2), :]
                cat_scr[0:ni, 2 * H:3 * H] = u_scr[off:off + ni, :]
                # fc_h as a single (ni, 3H) @ (3H, H) MXU pass (K=3H).
                h = jnp.dot(cat_scr[0:ni, :], wht,
                            preferred_element_type=jnp.float32)
                cur[0:ni, :] = jnp.maximum(h + bh, 0.0)
                if ni < size:  # outer nodes mixed into this level (not hit here)
                    cur[ni:size, :] = u_scr[off + ni:off + size, :]
            prev = cur

        # Fused Predict head on the root embeddings (one root per jet).
        e0 = prev[0:n_jets, :]
        h1 = jnp.dot(e0, slab_ref[L["w1"]:L["w1"] + H, :],
                     preferred_element_type=jnp.float32)
        h1 = jnp.maximum(h1 + slab_ref[m + 2:m + 3, :], 0.0)
        h2 = jnp.dot(h1, slab_ref[L["w2"]:L["w2"] + H, :],
                     preferred_element_type=jnp.float32)
        h2 = jnp.maximum(h2 + slab_ref[m + 3:m + 4, :], 0.0)
        # (m, 1) logit as a VPU/XLU reduction instead of an N=1 MXU pass.
        logit = jnp.sum(h2 * slab_ref[m + 4:m + 5, :], axis=-1, keepdims=True)
        logit = logit + slab_ref[m + 5:m + 6, 0:1]
        out_ref[...] = jax.nn.sigmoid(logit)

    grid_spec = pltpu.PrefetchScalarGridSpec(
        num_scalar_prefetch=0,
        grid=(1,),
        in_specs=[
            pl.BlockSpec((u_rows, f_pad), lambda i: (0, 0)),   # contents (padded)
            pl.BlockSpec((L["rows"], H), lambda i: (0, 0)),    # packed params
        ],
        out_specs=pl.BlockSpec((n_jets, 1), lambda i: (0, 0)),
        scratch_shapes=[
            pltpu.VMEM((u_rows, H), jnp.float32),       # relu(fc_u), all nodes
            pltpu.VMEM((emb_rows, H), jnp.float32),     # emb ping
            pltpu.VMEM((emb_rows, H), jnp.float32),     # emb pong
            pltpu.VMEM((cat_rows, 3 * H), jnp.float32), # [h_L | h_R | u] concat
        ],
    )

    return pl.pallas_call(
        kernel,
        out_shape=jax.ShapeDtypeStruct((n_jets, 1), jnp.float32),
        grid_spec=grid_spec,
        compiler_params=pltpu.CompilerParams(
            dimension_semantics=("arbitrary",)),
    )


# ------------------------------- forward pass ------------------------------

def predict_forward(children, n_inners, contents, params, n_jets,
                    n_features, n_hidden):
    level_sizes = [int(c.shape[0]) for c in contents]
    n_inners = [int(x) for x in n_inners]
    depth = len(level_sizes)

    # The kernel gathers children with strided slices, which requires the
    # complete-tree layout: children of inner node r are rows (2r, 2r+1) of
    # the next level.  Validate that here (cheap host-side check).
    for j in range(depth):
        ni = n_inners[j]
        if ni > 0:
            expect = np.stack([2 * np.arange(ni), 2 * np.arange(ni) + 1],
                              axis=1).astype(np.int32)
            if not np.array_equal(np.asarray(children[j], np.int32), expect):
                # TODO(synk): ragged jet trees need an index-driven gather path.
                raise NotImplementedError(
                    "fused kernel assumes complete-binary-tree batches")

    total_nodes = int(sum(level_sizes))
    u_rows = _round8(total_nodes)
    f_pad = _round8(n_features)

    contents_all = jnp.concatenate(list(contents), axis=0)
    contents_padded = jnp.zeros((u_rows, f_pad), jnp.float32)
    contents_padded = contents_padded.at[:total_nodes, :n_features].set(contents_all)

    slab = pack_param_slab(params, n_features, n_hidden)
    call = build_fused_predict(level_sizes, n_inners, n_features, n_hidden, n_jets)
    return call(contents_padded, slab)


def predict_reference(children, n_inners, contents, params, n_jets):
    """Pure-JAX reference mirroring the PyTorch forward (sanity check)."""
    hp = jax.lax.Precision.HIGHEST
    depth = len(contents)
    emb = None
    for i in range(depth):
        j = depth - 1 - i
        u_k = jnp.maximum(
            jnp.dot(contents[j], params["Wu"].T, precision=hp) + params["bu"], 0.0)
        ni = int(n_inners[j])
        if ni > 0:
            h_L = emb[children[j][:, 0]]
            h_R = emb[children[j][:, 1]]
            h_cat = jnp.concatenate([h_L, h_R, u_k[:ni]], axis=1)
            h = jnp.maximum(
                jnp.dot(h_cat, params["Wh"].T, precision=hp) + params["bh"], 0.0)
            emb = jnp.concatenate([h, u_k[ni:]], axis=0)
        else:
            emb = u_k
    out = emb.reshape(n_jets, -1)
    h = jnp.maximum(jnp.dot(out, params["W1"].T, precision=hp) + params["b1"], 0.0)
    h = jnp.maximum(jnp.dot(h, params["W2"].T, precision=hp) + params["b2"], 0.0)
    return jax.nn.sigmoid(jnp.dot(h, params["W3"].T, precision=hp) + params["b3"])


# ----------------------------------- main -----------------------------------

if __name__ == "__main__":
    n_features = 4
    n_hidden = 32
    n_jets = 2
    depth = 3  # each jet: complete binary tree with 7 nodes (4 leaves)

    key = jax.random.PRNGKey(0)
    k_params, k_data = jax.random.split(key)

    params = init_params(k_params, n_features, n_hidden)
    children, n_inners, contents = make_jet_batch(n_jets, depth, n_features, k_data)

    out = predict_forward(children, n_inners, contents, params, n_jets,
                          n_features, n_hidden)
    out = jax.block_until_ready(out)

    assert out.shape == (n_jets, 1)
    assert bool(jnp.all(jnp.isfinite(out)))
    assert bool(jnp.all((out >= 0.0) & (out <= 1.0)))

    ref = jax.block_until_ready(
        predict_reference(children, n_inners, contents, params, n_jets))
    # All-f32 kernel with f32 MXU accumulation: agreement should be tight.
    assert np.allclose(np.asarray(out), np.asarray(ref), atol=1e-4, rtol=1e-4)

    print("KERNEL_OK")
</pallas_src>

<mosaic_0001>
module attributes {stable_mosaic.version = 11 : i64} {
  func.func @kernel(%arg0: i32, %arg1: memref<16x8xf32, #tpu.memory_space<vmem>>, %arg2: memref<176x32xf32, #tpu.memory_space<vmem>>, %arg3: memref<2x1xf32, #tpu.memory_space<vmem>>, %arg4: memref<16x32xf32, #tpu.memory_space<vmem>>, %arg5: memref<8x32xf32, #tpu.memory_space<vmem>>, %arg6: memref<8x32xf32, #tpu.memory_space<vmem>>, %arg7: memref<8x96xf32, #tpu.memory_space<vmem>>) attributes {dimension_semantics = [#tpu.dimension_semantics<arbitrary>], iteration_bounds = array<i64: 1>, scalar_prefetch = 0 : i64, scratch_operands = 4 : i64, tpu.core_type = #tpu.core_type<tc>, window_params = [{pipeline_mode = #tpu.pipeline_mode<synchronous>, transform_indices = @transform_0, window_bounds = array<i64: 16, 8>}, {pipeline_mode = #tpu.pipeline_mode<synchronous>, transform_indices = @transform_1, window_bounds = array<i64: 176, 32>}, {pipeline_mode = #tpu.pipeline_mode<synchronous>, transform_indices = @transform_2, window_bounds = array<i64: 2, 1>}]} {
    %c168 = arith.constant 168 : index
    %c0 = arith.constant 0 : index
    %0 = vector.load %arg2[%c168, %c0] : memref<176x32xf32, #tpu.memory_space<vmem>>, vector<1x32xf32>
    %c169 = arith.constant 169 : index
    %c0_0 = arith.constant 0 : index
    %1 = vector.load %arg2[%c169, %c0_0] : memref<176x32xf32, #tpu.memory_space<vmem>>, vector<1x32xf32>
    %c8 = arith.constant 8 : index
    %c0_1 = arith.constant 0 : index
    %2 = vector.load %arg2[%c8, %c0_1] : memref<176x32xf32, #tpu.memory_space<vmem>>, vector<96x32xf32>
    %c0_2 = arith.constant 0 : index
    %c0_3 = arith.constant 0 : index
    %3 = vector.load %arg1[%c0_2, %c0_3] : memref<16x8xf32, #tpu.memory_space<vmem>>, vector<16x8xf32>
    %c0_4 = arith.constant 0 : index
    %c0_5 = arith.constant 0 : index
    %4 = vector.load %arg2[%c0_4, %c0_5] : memref<176x32xf32, #tpu.memory_space<vmem>>, vector<8x32xf32>
    %cst = arith.constant dense<0.000000e+00> : vector<16x32xf32>
    %5 = tpu.matmul %3, %4, %cst {dimension_numbers = #tpu.dot_dimension_numbers<[1], [0], [0], [1], [0, 0, 1, 1], [], []>} : vector<16x8xf32>, vector<8x32xf32>, vector<16x32xf32> -> vector<16x32xf32>
    %6 = vector.broadcast %0 : vector<1x32xf32> to vector<16x32xf32>
    %7 = arith.addf %5, %6 : vector<16x32xf32>
    %cst_6 = arith.constant 0.000000e+00 : f32
    %8 = vector.broadcast %cst_6 : f32 to vector<16x32xf32>
    %9 = arith.maximumf %7, %8 : vector<16x32xf32>
    %c0_7 = arith.constant 0 : index
    %c0_8 = arith.constant 0 : index
    %10 = vector.load %arg4[%c0_7, %c0_8] : memref<16x32xf32, #tpu.memory_space<vmem>>, vector<16x32xf32>
    tpu.vector_store %arg4[%c0_7, %c0_8], %9 {strides = array<i32>} : memref<16x32xf32, #tpu.memory_space<vmem>>, vector<16x32xf32>,
    %c6 = arith.constant 6 : index
    %c0_9 = arith.constant 0 : index
    %11 = vector.load %arg4[%c6, %c0_9] : memref<16x32xf32, #tpu.memory_space<vmem>>, vector<8x32xf32>
    %c0_10 = arith.constant 0 : index
    %c0_11 = arith.constant 0 : index
    %12 = vector.load %arg5[%c0_10, %c0_11] : memref<8x32xf32, #tpu.memory_space<vmem>>, vector<8x32xf32>
    tpu.vector_store %arg5[%c0_10, %c0_11], %11 {strides = array<i32>} : memref<8x32xf32, #tpu.memory_space<vmem>>, vector<8x32xf32>,
    %c0_12 = arith.constant 0 : index
    %c0_13 = arith.constant 0 : index
    %13 = tpu.strided_load %arg5[%c0_12, %c0_13] {strides = array<i32: 2, 1>} : memref<8x32xf32, #tpu.memory_space<vmem>>, vector<4x32xf32>
    %c0_14 = arith.constant 0 : index
    %c0_15 = arith.constant 0 : index
    %14 = vector.load %arg7[%c0_14, %c0_15] : memref<8x96xf32, #tpu.memory_space<vmem>>, vector<4x32xf32>
    tpu.vector_store %arg7[%c0_14, %c0_15], %13 {strides = array<i32>} : memref<8x96xf32, #tpu.memory_space<vmem>>, vector<4x32xf32>,
    %c1 = arith.constant 1 : index
    %c0_16 = arith.constant 0 : index
    %15 = tpu.strided_load %arg5[%c1, %c0_16] {strides = array<i32: 2, 1>} : memref<8x32xf32, #tpu.memory_space<vmem>>, vector<4x32xf32>
    %c0_17 = arith.constant 0 : index
    %c32 = arith.constant 32 : index
    %16 = vector.load %arg7[%c0_17, %c32] : memref<8x96xf32, #tpu.memory_space<vmem>>, vector<4x32xf32>
    tpu.vector_store %arg7[%c0_17, %c32], %15 {strides = array<i32>} : memref<8x96xf32, #tpu.memory_space<vmem>>, vector<4x32xf32>,
    %c2 = arith.constant 2 : index
    %c0_18 = arith.constant 0 : index
    %17 = vector.load %arg4[%c2, %c0_18] : memref<16x32xf32, #tpu.memory_space<vmem>>, vector<4x32xf32>
    %c0_19 = arith.constant 0 : index
    %c64 = arith.constant 64 : index
    %18 = vector.load %arg7[%c0_19, %c64] : memref<8x96xf32, #tpu.memory_space<vmem>>, vector<4x32xf32>
    tpu.vector_store %arg7[%c0_19, %c64], %17 {strides = array<i32>} : memref<8x96xf32, #tpu.memory_space<vmem>>, vector<4x32xf32>,
    %c0_20 = arith.constant 0 : index
    %c0_21 = arith.constant 0 : index
    %19 = vector.load %arg7[%c0_20, %c0_21] : memref<8x96xf32, #tpu.memory_space<vmem>>, vector<4x96xf32>
    %cst_22 = arith.constant dense<0.000000e+00> : vector<4x32xf32>
    %20 = tpu.matmul %19, %2, %cst_22 {dimension_numbers = #tpu.dot_dimension_numbers<[1], [0], [0], [1], [0, 0, 1, 1], [], []>} : vector<4x96xf32>, vector<96x32xf32>, vector<4x32xf32> -> vector<4x32xf32>
    %21 = vector.broadcast %1 : vector<1x32xf32> to vector<4x32xf32>
    %22 = arith.addf %20, %21 : vector<4x32xf32>
    %cst_23 = arith.constant 0.000000e+00 : f32
    %23 = vector.broadcast %cst_23 : f32 to vector<4x32xf32>
    %24 = arith.maximumf %22, %23 : vector<4x32xf32>
    %c0_24 = arith.constant 0 : index
    %c0_25 = arith.constant 0 : index
    %25 = vector.load %arg6[%c0_24, %c0_25] : memref<8x32xf32, #tpu.memory_space<vmem>>, vector<4x32xf32>
    tpu.vector_store %arg6[%c0_24, %c0_25], %24 {strides = array<i32>} : memref<8x32xf32, #tpu.memory_space<vmem>>, vector<4x32xf32>,
    %c0_26 = arith.constant 0 : index
    %c0_27 = arith.constant 0 : index
    %26 = tpu.strided_load %arg6[%c0_26, %c0_27] {strides = array<i32: 2, 1>} : memref<8x32xf32, #tpu.memory_space<vmem>>, vector<2x32xf32>
    %c0_28 = arith.constant 0 : index
    %c0_29 = arith.constant 0 : index
    %27 = vector.load %arg7[%c0_28, %c0_29] : memref<8x96xf32, #tpu.memory_space<vmem>>, vector<2x32xf32>
    tpu.vector_store %arg7[%c0_28, %c0_29], %26 {strides = array<i32>} : memref<8x96xf32, #tpu.memory_space<vmem>>, vector<2x32xf32>,
    %c1_30 = arith.constant 1 : index
    %c0_31 = arith.constant 0 : index
    %28 = tpu.strided_load %arg6[%c1_30, %c0_31] {strides = array<i32: 2, 1>} : memref<8x32xf32, #tpu.memory_space<vmem>>, vector<2x32xf32>
    %c0_32 = arith.constant 0 : index
    %c32_33 = arith.constant 32 : index
    %29 = vector.load %arg7[%c0_32, %c32_33] : memref<8x96xf32, #tpu.memory_space<vmem>>, vector<2x32xf32>
    tpu.vector_store %arg7[%c0_32, %c32_33], %28 {strides = array<i32>} : memref<8x96xf32, #tpu.memory_space<vmem>>, vector<2x32xf32>,
    %c0_34 = arith.constant 0 : index
    %c0_35 = arith.constant 0 : index
    %30 = vector.load %arg4[%c0_34, %c0_35] : memref<16x32xf32, #tpu.memory_space<vmem>>, vector<2x32xf32>
    %c0_36 = arith.constant 0 : index
    %c64_37 = arith.constant 64 : index
    %31 = vector.load %arg7[%c0_36, %c64_37] : memref<8x96xf32, #tpu.memory_space<vmem>>, vector<2x32xf32>
    tpu.vector_store %arg7[%c0_36, %c64_37], %30 {strides = array<i32>} : memref<8x96xf32, #tpu.memory_space<vmem>>, vector<2x32xf32>,
    %c0_38 = arith.constant 0 : index
    %c0_39 = arith.constant 0 : index
    %32 = vector.load %arg7[%c0_38, %c0_39] : memref<8x96xf32, #tpu.memory_space<vmem>>, vector<2x96xf32>
    %cst_40 = arith.constant dense<0.000000e+00> : vector<2x32xf32>
    %33 = tpu.matmul %32, %2, %cst_40 {dimension_numbers = #tpu.dot_dimension_numbers<[1], [0], [0], [1], [0, 0, 1, 1], [], []>} : vector<2x96xf32>, vector<96x32xf32>, vector<2x32xf32> -> vector<2x32xf32>
    %34 = vector.broadcast %1 : vector<1x32xf32> to vector<2x32xf32>
    %35 = arith.addf %33, %34 : vector<2x32xf32>
    %cst_41 = arith.constant 0.000000e+00 : f32
    %36 = vector.broadcast %cst_41 : f32 to vector<2x32xf32>
    %37 = arith.maximumf %35, %36 : vector<2x32xf32>
    %c0_42 = arith.constant 0 : index
    %c0_43 = arith.constant 0 : index
    %38 = vector.load %arg5[%c0_42, %c0_43] : memref<8x32xf32, #tpu.memory_space<vmem>>, vector<2x32xf32>
    tpu.vector_store %arg5[%c0_42, %c0_43], %37 {strides = array<i32>} : memref<8x32xf32, #tpu.memory_space<vmem>>, vector<2x32xf32>,
    %c0_44 = arith.constant 0 : index
    %c0_45 = arith.constant 0 : index
    %39 = vector.load %arg5[%c0_44, %c0_45] : memref<8x32xf32, #tpu.memory_space<vmem>>, vector<2x32xf32>
    %c104 = arith.constant 104 : index
    %c0_46 = arith.constant 0 : index
    %40 = vector.load %arg2[%c104, %c0_46] : memref<176x32xf32, #tpu.memory_space<vmem>>, vector<32x32xf32>
    %cst_47 = arith.constant dense<0.000000e+00> : vector<2x32xf32>
    %41 = tpu.matmul %39, %40, %cst_47 {dimension_numbers = #tpu.dot_dimension_numbers<[1], [0], [0], [1], [0, 0, 1, 1], [], []>} : vector<2x32xf32>, vector<32x32xf32>, vector<2x32xf32> -> vector<2x32xf32>
    %c170 = arith.constant 170 : index
    %c0_48 = arith.constant 0 : index
    %42 = vector.load %arg2[%c170, %c0_48] : memref<176x32xf32, #tpu.memory_space<vmem>>, vector<1x32xf32>
    %43 = vector.broadcast %42 : vector<1x32xf32> to vector<2x32xf32>
    %44 = arith.addf %41, %43 : vector<2x32xf32>
    %cst_49 = arith.constant 0.000000e+00 : f32
    %45 = vector.broadcast %cst_49 : f32 to vector<2x32xf32>
    %46 = arith.maximumf %44, %45 : vector<2x32xf32>
    %c136 = arith.constant 136 : index
    %c0_50 = arith.constant 0 : index
    %47 = vector.load %arg2[%c136, %c0_50] : memref<176x32xf32, #tpu.memory_space<vmem>>, vector<32x32xf32>
    %cst_51 = arith.constant dense<0.000000e+00> : vector<2x32xf32>
    %48 = tpu.matmul %46, %47, %cst_51 {dimension_numbers = #tpu.dot_dimension_numbers<[1], [0], [0], [1], [0, 0, 1, 1], [], []>} : vector<2x32xf32>, vector<32x32xf32>, vector<2x32xf32> -> vector<2x32xf32>
    %c171 = arith.constant 171 : index
    %c0_52 = arith.constant 0 : index
    %49 = vector.load %arg2[%c171, %c0_52] : memref<176x32xf32, #tpu.memory_space<vmem>>, vector<1x32xf32>
    %50 = vector.broadcast %49 : vector<1x32xf32> to vector<2x32xf32>
    %51 = arith.addf %48, %50 : vector<2x32xf32>
    %cst_53 = arith.constant 0.000000e+00 : f32
    %52 = vector.broadcast %cst_53 : f32 to vector<2x32xf32>
    %53 = arith.maximumf %51, %52 : vector<2x32xf32>
    %c172 = arith.constant 172 : index
    %c0_54 = arith.constant 0 : index
    %54 = vector.load %arg2[%c172, %c0_54] : memref<176x32xf32, #tpu.memory_space<vmem>>, vector<1x32xf32>
    %55 = vector.broadcast %54 : vector<1x32xf32> to vector<2x32xf32>
    %56 = arith.mulf %53, %55 : vector<2x32xf32>
    %cst_55 = arith.constant dense<0.000000e+00> : vector<2xf32>
    %57 = vector.multi_reduction <add>, %56, %cst_55 [1] : vector<2x32xf32> to vector<2xf32>
    %58 = vector.shape_cast %57 : vector<2xf32> to vector<2x1xf32>
    %c173 = arith.constant 173 : index
    %c0_56 = arith.constant 0 : index
    %59 = vector.load %arg2[%c173, %c0_56] : memref<176x32xf32, #tpu.memory_space<vmem>>, vector<1x1xf32>
    %60 = vector.broadcast %59 : vector<1x1xf32> to vector<2x1xf32>
    %61 = arith.addf %58, %60 : vector<2x1xf32>
    %62 = arith.negf %61 : vector<2x1xf32>
    %63 = math.exp %62 : vector<2x1xf32>
    %cst_57 = arith.constant 1.000000e+00 : f32
    %64 = vector.broadcast %cst_57 : f32 to vector<2x1xf32>
    %65 = arith.addf %64, %63 : vector<2x1xf32>
    %66 = arith.divf %64, %65 : vector<2x1xf32>
    %c0_58 = arith.constant 0 : index
    %c0_59 = arith.constant 0 : index
    %67 = vector.load %arg3[%c0_58, %c0_59] : memref<2x1xf32, #tpu.memory_space<vmem>>, vector<2x1xf32>
    tpu.vector_store %arg3[%c0_58, %c0_59], %66 {strides = array<i32>} : memref<2x1xf32, #tpu.memory_space<vmem>>, vector<2x1xf32>,
    return
  }
  func.func @transform_0(%arg0: i32) -> (i32, i32) {
    %c0_i32 = arith.constant 0 : i32
    %c0_i32_0 = arith.constant 0 : i32
    %c0_i32_1 = arith.constant 0 : i32
    return %c0_i32, %c0_i32_0 : i32, i32
  }
  func.func @transform_1(%arg0: i32) -> (i32, i32) {
    %c0_i32 = arith.constant 0 : i32
    %c0_i32_0 = arith.constant 0 : i32
    %c0_i32_1 = arith.constant 0 : i32
    return %c0_i32, %c0_i32_0 : i32, i32
  }
  func.func @transform_2(%arg0: i32) -> (i32, i32) {
    %c0_i32 = arith.constant 0 : i32
    %c0_i32_0 = arith.constant 0 : i32
    %c0_i32_1 = arith.constant 0 : i32
    return %c0_i32, %c0_i32_0 : i32, i32
  }
}

</mosaic_0001>

<bundles_post_ra>
// kernel: tpu_custom_call.1
= control target key start
LH: loop header
LB: loop body
LE: loop exit
PB: predicated region body
PF: predicated region fallthrough
CT: control target
= control target key end

     0   :  { %vm32_vm0 = vcmask 64512   ;;  %v698_v6 = vmov 0.0|0.0   ;;  %vm116_vm1 = vcmask 261120   ;;  %vm699_vm2 = vmmov 0   ;;  %s701_s12 = smov 32   ;;  %s702_s13 = smov 64   ;;  %s840_s1 = inlined_call_operand.vmem [shape: f32[176,32], index: 1, kind: input, shape index: {}]   ;;  %s841_s0 = inlined_call_operand.vmem [shape: f32[16,8], index: 0, kind: input, shape index: {}]   ;;  %s842_s2 = inlined_call_operand.vmem [shape: f32[2,1], index: 2, kind: output, shape index: {}]  }
   0x1   :  { %v27_v0 = vld [vmem:[%s840_s1] sm:$0xff]  ;;  %v26_v2 = vld [vmem:[%s841_s0 + $0x8] sm:$0xff]  ;;  %v14_v4 = vld [vmem:[%s840_s1 + $0x10] sm:$0xff]  ;;  %641 = vmatprep.subr.bf16.mxu1 %v698_v6  ;;  %v700_v29 = vmov 0.0   ;;  %vm122_vm3 = vcmask 257024   ;;  %vm130_vm4 = vcmask 519424  }
   0x2   :  { %v25_v1 = vld [vmem:[%s841_s0] sm:$0xff]  ;;  %560 = vmatprep.subr.mxu0 %v27_v0  ;;  %v13_v3 = vld [vmem:[%s840_s1 + $0x8] sm:$0xff]  ;;  %v15_v5 = vld [vmem:[%s840_s1 + $0x18] sm:$0xff]  ;;  %589 = vmatprep.mubr.msk.f32.mxu1 %vm699_vm2, %v700_v29  ;;  %vm137_vm5 = vcmask 781824   ;;  %vm144_vm6 = vcmask 785408   ;;  %vm221_vm7 = vcmask 254976  }
   0x3   :  { %562 = vmatprep.mubr.msk.f32.mxu0 %vm32_vm0, %v25_v1  ;;  %561 = vmatpush3.msra.mxu0 %v27_v0  ;;  %v642_v7 = vpack.c.bf16 %v14_v4, %v13_v3  ;;  %v16_v8 = vld [vmem:[%s840_s1 + $0x20] sm:$0xff]  ;;  %v17_v10 = vld [vmem:[%s840_s1 + $0x28] sm:$0xff]  ;;  %v18_v11 = vld [vmem:[%s840_s1 + $0x30] sm:$0xff]  ;;  %vm229_vm8 = vcmask 517376   ;;  %vm236_vm9 = vcmask 779776   ;;  %vm502_vm10 = vcmask 1024  }
   0x4   :  { %563 = vmatmul.mubr.msk.f32.vlgmr.msra.gmra.mrb[0].mxu0 %vm32_vm0, %v26_v2  ;;  %659 = vmatprep.subr.bf16.mxu0 %v698_v6  ;;  %v645_v9 = vpack.c.bf16 %v16_v8, %v15_v5  ;;  %v648_v12 = vpack.c.bf16 %v18_v11, %v17_v10  ;;  %v508_v13 = vld [vmem:[%s840_s1 + $0xa8] ss:$0 sm:$0xff]  ;;  %v19_v20 = vld [vmem:[%s840_s1 + $0x38] sm:$0xff]  ;;  %v20_v21 = vld [vmem:[%s840_s1 + $0x40] sm:$0xff] }
   0x5   :  { %643 = vmatpush3.bf16.msra.mxu1 %v642_v7  ;;  %661 = vmatpush3.bf16.msra.mxu0 %v642_v7  ;;  %v651_v22 = vpack.c.bf16 %v20_v21, %v19_v20  ;;  %v21_v23 = vld [vmem:[%s840_s1 + $0x48] sm:$0xff]  ;;  %v22_v24 = vld [vmem:[%s840_s1 + $0x50] sm:$0xff]  ;;  %v23_v27 = vld [vmem:[%s840_s1 + $0x58] sm:$0xff] }
   0x6   :  { %644 = vmatprep.subr.bf16.mxu1 %v698_v6  ;;  %662 = vmatprep.subr.bf16.mxu0 %v698_v6  ;;  %v654_v25 = vpack.c.bf16 %v22_v24, %v21_v23  ;;  %v24_v28 = vld [vmem:[%s840_s1 + $0x60] sm:$0xff]  ;;  %v511_v37 = vld [vmem:[%s840_s1 + $0xa9] ss:$0 sm:$0xff]  ;;  %v316_v49 = vld [vmem:[%s840_s1 + $0x70] sm:$0xff] }
   0x7   :  { %v657_v30 = vpack.c.bf16 %v24_v28, %v23_v27  ;;  %616 = vmatprep.mubr.msk.f32.mxu0 %vm699_vm2, %v700_v29  ;;  %v315_v48 = vld [vmem:[%s840_s1 + $0x68] sm:$0xff]  ;;  %v317_v51 = vld [vmem:[%s840_s1 + $0x78] sm:$0xff]  ;;  %v318_v52 = vld [vmem:[%s840_s1 + $0x80] sm:$0xff] }
   0x8   :  { %v678_v50 = vpack.c.bf16 %v316_v49, %v315_v48  ;;  %v681_v53 = vpack.c.bf16 %v318_v52, %v317_v51  ;;  %v398_v54 = vld [vmem:[%s840_s1 + $0x88] sm:$0xff]  ;;  %v399_v55 = vld [vmem:[%s840_s1 + $0x90] sm:$0xff]  ;;  %v400_v62 = vld [vmem:[%s840_s1 + $0x98] sm:$0xff] }
   0x9   :  { %646 = vmatpush3.bf16.msra.mxu1 %v645_v9  ;;  %664 = vmatpush3.bf16.msra.mxu0 %v645_v9  ;;  %v684_v56 = vpack.c.bf16 %v399_v55, %v398_v54  ;;  %v401_v63 = vld [vmem:[%s840_s1 + $0xa0] sm:$0xff]  ;;  %v514_v1 = vld [vmem:[%s840_s1 + $0xaa] ss:$0 sm:$0xff]  ;;  %v518_v10 = vld [vmem:[%s840_s1 + $0xac] ss:$0 sm:$0xff] }
   0xa   :  { %647 = vmatprep.subr.bf16.mxu1 %v698_v6  ;;  %665 = vmatprep.subr.bf16.mxu0 %v698_v6  ;;  %v687_v0 = vpack.c.bf16 %v401_v63, %v400_v62 }
   0xd   :  { %649 = vmatpush3.bf16.msra.mxu1 %v648_v12  ;;  %667 = vmatpush3.bf16.msra.mxu0 %v648_v12 }
   0xe   :  { %650 = vmatprep.subr.bf16.mxu1 %v698_v6  ;;  %668 = vmatprep.subr.bf16.mxu0 %v698_v6 }
  0x11   :  { %652 = vmatpush3.bf16.msra.mxu1 %v651_v22  ;;  %670 = vmatpush3.bf16.msra.mxu0 %v651_v22 }
  0x12   :  { %653 = vmatprep.subr.bf16.mxu1 %v698_v6  ;;  %671 = vmatprep.subr.bf16.mxu0 %v698_v6 }
  0x15   :  { %655 = vmatpush3.bf16.msra.mxu1 %v654_v25  ;;  %673 = vmatpush3.bf16.msra.mxu0 %v654_v25 }
  0x16   :  { %656 = vmatprep.subr.bf16.mxu1 %v698_v6  ;;  %674 = vmatprep.subr.bf16.mxu0 %v698_v6 }
  0x19   :  { %658 = vmatpush3.bf16.msra.mxu1 %v657_v30  ;;  %676 = vmatpush3.bf16.msra.mxu0 %v657_v30 }
  0x1a   :  { %677 = vmatprep.subr.bf16.mxu1 %v698_v6  ;;  %683 = vmatprep.subr.bf16.mxu0 %v698_v6 }
  0xd7   :  { %v564_v14 = vpop.f32.mrb[0].mxu0 }
  0xd8   :  { %v111_v15 = vadd.f32 %v564_v14, %v508_v13  ;;  %v105_v16 = vpop.f32.mrb[1].mxu0  ;;  %v519_v14 = vld [vmem:[%s840_s1 + $0xad] ss:$0 sm:$0xff] }
  0xd9   :  { %v106_v17 = vadd.f32 %v508_v13, %v105_v16 }
  0xda   :  { %v115_v18 = vmax.f32 %v111_v15, 0.0 }
  0xdb   :  { %v114_v19 = vmax.f32 %v106_v17, 0.0 }
  0xdc   :  { %118 = vst.msk [vmem:[#allocation2 + $0x8] sm:$0xff] %vm116_vm1, %v115_v18 }
  0xdd   :  { %117 = vst.msk [vmem:[#allocation2] sm:$0xff] %vm116_vm1, %v114_v19 }
  0xe4   :  { %v119_v26 = vld [vmem:[#allocation2 + $0x6] sm:$0xff]  ;;  %v132_v33 = vld [vmem:[#allocation2 + $0x2] sm:$0xf]  ;;  %v231_v44 = vld [vmem:[#allocation2] sm:$0x3] }
  0xe5   :  { %120 = vst.msk [vmem:[#allocation3] sm:$0xff] %vm116_vm1, %v119_v26 }
  0xec   :  { %v125_v31 = vld [vmem:[#allocation3 + $0x1] ss:$2 sm:$0xf]  ;;  %v121_v32 = vld [vmem:[#allocation3] ss:$2 sm:$0xf] }
  0xed   :  { %127 = vrot.lane.b32.xlu0 %v125_v31, %s701_s12  ;;  %123 = vst.msk [vmem:[#allocation5] sm:$0xf] %vm122_vm3, %v121_v32 }
  0xf1   :  { %134 = vrot.lane.b32.xlu0 %v132_v33, %s702_s13 }
 0x15f   :  { %v128_v34 = vpop.permute.xlu0 %127 }
 0x160   :  { %131 = vst.msk [vmem:[#allocation5] sm:$0xf] %vm130_vm4, %v128_v34 }
 0x163   :  { %v135_v35 = vpop.permute.xlu0 %134 }
 0x164   :  { %138 = vst.msk [vmem:[#allocation5] sm:$0xf] %vm137_vm5, %v135_v35 }
 0x16b   :  { %v139_v36 = vld [vmem:[#allocation5] sm:$0xf] }
 0x16c   :  { %590 = vmatmul.mubr.msk.f32.vlgmr.msra.gmra.mrb[0].mxu1 %vm144_vm6, %v139_v36 }
 0x16d   :  { %627 = vmatprep.mubr.msk.f32.mxu1 %vm699_vm2, %v700_v29  ;;  %679 = vmatpush3.bf16.msra.mxu1 %v678_v50 }
 0x16e   :  { %680 = vmatprep.subr.bf16.mxu1 %v698_v6 }
 0x171   :  { %682 = vmatpush3.bf16.msra.mxu1 %v681_v53 }
 0x23f   :  { %v214_v38 = vpop.f32.mrb[0].mxu1 }
 0x240   :  { %v215_v39 = vadd.f32 %v511_v37, %v214_v38  ;;  %v591_v40 = vpop.f32.mrb[1].mxu1 }
 0x242   :  { %v218_v41 = vmax.f32 %v215_v39, 0.0 }
 0x244   :  { %219 = vst.msk [vmem:[#allocation4] sm:$0xf] %vm122_vm3, %v218_v41 }
 0x24b   :  { %v224_v42 = vld [vmem:[#allocation4 + $0x1] ss:$2 sm:$0x3]  ;;  %v220_v43 = vld [vmem:[#allocation4] ss:$2 sm:$0x3] }
 0x24c   :  { %226 = vrot.lane.b32.xlu1 %v224_v42, %s701_s12  ;;  %222 = vst.msk [vmem:[#allocation5] sm:$0x3] %vm221_vm7, %v220_v43 }
 0x250   :  { %233 = vrot.lane.b32.xlu1 %v231_v44, %s702_s13 }
 0x2be   :  { %v227_v45 = vpop.permute.xlu1 %226 }
 0x2bf   :  { %230 = vst.msk [vmem:[#allocation5] sm:$0x3] %vm229_vm8, %v227_v45 }
 0x2c2   :  { %v234_v46 = vpop.permute.xlu1 %233 }
 0x2c3   :  { %237 = vst.msk [vmem:[#allocation5] sm:$0x3] %vm236_vm9, %v234_v46 }
 0x2ca   :  { %v238_v47 = vld [vmem:[#allocation5] sm:$0x3] }
 0x2cb   :  { %617 = vmatmul.mubr.msk.f32.vlgmr.msra.gmra.mrb[2].mxu0 %vm144_vm6, %v238_v47 }
 0x2cc   :  { %638 = vmatprep.mubr.msk.f32.mxu0 %vm699_vm2, %v700_v29  ;;  %685 = vmatpush3.bf16.msra.mxu0 %v684_v56 }
 0x2cd   :  { %686 = vmatprep.subr.bf16.mxu0 %v698_v6  ;;  %v516_v6 = vld [vmem:[%s840_s1 + $0xab] ss:$0 sm:$0xff] }
 0x2d0   :  { %688 = vmatpush3.bf16.msra.mxu0 %v687_v0 }
 0x39e   :  { %v308_v57 = vpop.f32.mrb[2].mxu0 }
 0x39f   :  { %v309_v58 = vadd.f32 %v511_v37, %v308_v57  ;;  %v618_v59 = vpop.f32.mrb[3].mxu0 }
 0x3a1   :  { %v312_v60 = vmax.f32 %v309_v58, 0.0 }
 0x3a3   :  { %313 = vst.msk [vmem:[#allocation3] sm:$0x3] %vm221_vm7, %v312_v60 }
 0x3aa   :  { %v314_v61 = vld [vmem:[#allocation3] sm:$0x3] }
 0x3ab   :  { %628 = vmatmul.mubr.msk.f32.vlgmr.msra.gmra.mrb[2].mxu1 %vm116_vm1, %v314_v61 }
 0x47e   :  { %v393_v2 = vpop.f32.mrb[2].mxu1 }
 0x47f   :  { %v394_v3 = vadd.f32 %v514_v1, %v393_v2  ;;  %v629_v4 = vpop.f32.mrb[3].mxu1 }
 0x481   :  { %v397_v5 = vmax.f32 %v394_v3, 0.0 }
 0x483   :  { %639 = vmatmul.mubr.msk.f32.vlgmr.msra.gmra.mrb[4].mxu0 %vm116_vm1, %v397_v5 }
 0x556   :  { %v476_v7 = vpop.f32.mrb[4].mxu0 }
 0x557   :  { %v477_v8 = vadd.f32 %v516_v6, %v476_v7  ;;  %v640_v9 = vpop.f32.mrb[5].mxu0 }
 0x559   :  { %v480_v11 = vmax.f32 %v477_v8, 0.0 }
 0x55b   :  { %v486_v12 = vmul.f32 %v518_v10, %v480_v11 }
 0x55d   :  { %v487_v13 = vsel %vm221_vm7, %v486_v12, 0.0 }
 0x55e   :  { %488 = vadd.xlane.f32.xlu0 %v487_v13 }
 0x5eb   :  { %v489_v15 = vpop.xlane.xlu0 %488 }
 0x5ec   :  { %v495_v16 = vadd.f32 %v519_v14, %v489_v15 }
 0x5ee   :  { %v520_v17 = vmul.f32 -1.442695, %v495_v16 }
 0x5f0   :  { %694 = vpow2.f32 %v520_v17 }
 0x5fa   :  { %v695_v18 = vpop.eup %694 }
 0x5fb   :  { %v499_v19 = vadd.f32 1.0, %v695_v18 }
 0x5fd   :  { %696 = vrcp.f32 %v499_v19 }
 0x607   :  { %v697_v20 = vpop.eup %696 }
 0x608   :  { %503 = vst.msk [vmem:[%s842_s2] sm:$0x3] %vm502_vm10, %v697_v20 }

</bundles_post_ra>
